<compile_context>
chip_gen: v6e
topology: v6e:2x2x1
jax: 0.10.0
libtpu: 0.0.40
codegen_flags: <defaults>
</compile_context>

<pallas_src>
import jax
import jax.numpy as jnp
from jax import lax
from jax.experimental import pallas as pl
from jax.experimental.pallas import tpu as pltpu

HIDDEN_LAYER_SIZE = 50
IN_FEATURES = 2
OUT_FEATURES = 2
_BATCH_TILE = 256  # multiple of 8 sublanes; used only when batch > one tile


def _mlp(y, w1, b1, w2, b2):
    """ODEFunc body: Linear2(tanh(Linear1(y**3))). Linear1 on the VPU."""
    x = y * y * y                                           # y ** 3
    # K=2 contraction as broadcast mul/add (skip the padded MXU pass).
    h = x[:, 0:1] * w1[0:1, :] + x[:, 1:2] * w1[1:2, :] + b1  # (B, 50)
    h = jnp.tanh(h)                                         # EUP transcendental
    # K=50 contraction stays on the MXU.
    return jnp.dot(h, w2, preferred_element_type=jnp.float32) + b2  # (B, 2)


def _odefunc_kernel(t_ref, y_ref, w1_ref, b1_ref, w2_ref, b2_ref, out_ref):
    del t_ref  # ODEFunc.forward ignores t (kept in SMEM for API parity / fusion)
    out = _mlp(y_ref[...].astype(jnp.float32),
               w1_ref[...], b1_ref[...], w2_ref[...], b2_ref[...])
    # NOTE: out last-dim is 2 (masked stores); for very large batches a
    # lane-dense (2, B) transposed layout would be faster — negligible here.
    out_ref[...] = out.astype(out_ref.dtype)


def _odefunc_euler_kernel(nsteps_ref, dt_ref, t0_ref,
                          y_ref, w1_ref, b1_ref, w2_ref, b2_ref, out_ref):
    """Fused forward-Euler integration: y_{k+1} = y_k + dt * f(t_k, y_k)."""
    del t0_ref  # f ignores t
    w1 = w1_ref[...]
    b1 = b1_ref[...]
    w2 = w2_ref[...]
    b2 = b2_ref[...]
    dt = dt_ref[0]

    def body(_, y):
        return y + dt * _mlp(y, w1, b1, w2, b2)

    y_final = lax.fori_loop(0, nsteps_ref[0], body, y_ref[...].astype(jnp.float32))
    out_ref[...] = y_final.astype(out_ref.dtype)


def _batch_tiling(B):
    """Returns (tile, padded_B, num_tiles)."""
    if B <= _BATCH_TILE:
        return B, B, 1            # single full-array block (always legal)
    tile = _BATCH_TILE            # multiple of 8 sublanes
    nt = -(-B // tile)
    return tile, nt * tile, nt


def odefunc_forward(t, y, w1, b1, w2, b2):
    """t: scalar (ignored by forward, parity with PyTorch). y: (B, 2) float32."""
    B = y.shape[0]
    tile, Bp, nt = _batch_tiling(B)
    y_p = jnp.pad(y, ((0, Bp - B), (0, 0))) if Bp != B else y
    t_arr = jnp.asarray(t, jnp.float32).reshape(1)

    out = pl.pallas_call(
        _odefunc_kernel,
        out_shape=jax.ShapeDtypeStruct((Bp, OUT_FEATURES), jnp.float32),
        grid_spec=pltpu.PrefetchScalarGridSpec(
            num_scalar_prefetch=1,
            grid=(nt,),
            in_specs=[
                pl.BlockSpec((tile, IN_FEATURES), lambda i, t: (i, 0)),
                pl.BlockSpec(w1.shape, lambda i, t: (0, 0)),
                pl.BlockSpec(b1.shape, lambda i, t: (0, 0)),
                pl.BlockSpec(w2.shape, lambda i, t: (0, 0)),
                pl.BlockSpec(b2.shape, lambda i, t: (0, 0)),
            ],
            out_specs=pl.BlockSpec((tile, OUT_FEATURES), lambda i, t: (i, 0)),
        ),
        compiler_params=pltpu.CompilerParams(dimension_semantics=("parallel",)),
    )(t_arr, y_p, w1, b1, w2, b2)
    return out[:B] if Bp != B else out


def odefunc_euler_fused(t0, dt, n_steps, y0, w1, b1, w2, b2):
    """Whole Euler integration in one pallas_call (weights pinned in VMEM)."""
    B = y0.shape[0]
    tile, Bp, nt = _batch_tiling(B)
    y_p = jnp.pad(y0, ((0, Bp - B), (0, 0))) if Bp != B else y0
    n_arr = jnp.asarray(n_steps, jnp.int32).reshape(1)
    dt_arr = jnp.asarray(dt, jnp.float32).reshape(1)
    t0_arr = jnp.asarray(t0, jnp.float32).reshape(1)

    out = pl.pallas_call(
        _odefunc_euler_kernel,
        out_shape=jax.ShapeDtypeStruct((Bp, OUT_FEATURES), jnp.float32),
        grid_spec=pltpu.PrefetchScalarGridSpec(
            num_scalar_prefetch=3,
            grid=(nt,),
            in_specs=[
                pl.BlockSpec((tile, IN_FEATURES), lambda i, n, d, t0: (i, 0)),
                pl.BlockSpec(w1.shape, lambda i, n, d, t0: (0, 0)),
                pl.BlockSpec(b1.shape, lambda i, n, d, t0: (0, 0)),
                pl.BlockSpec(w2.shape, lambda i, n, d, t0: (0, 0)),
                pl.BlockSpec(b2.shape, lambda i, n, d, t0: (0, 0)),
            ],
            out_specs=pl.BlockSpec((tile, OUT_FEATURES), lambda i, n, d, t0: (i, 0)),
        ),
        compiler_params=pltpu.CompilerParams(dimension_semantics=("parallel",)),
    )(n_arr, dt_arr, t0_arr, y_p, w1, b1, w2, b2)
    return out[:B] if Bp != B else out


def init_params(key):
    """Deterministic init matching nn.init.normal_(std=0.1) / constant_(0)."""
    k1, k2 = jax.random.split(key)
    # Stored as (in, out) so the kernel does x @ W (PyTorch stores (out, in)).
    w1 = 0.1 * jax.random.normal(k1, (IN_FEATURES, HIDDEN_LAYER_SIZE), jnp.float32)
    b1 = jnp.zeros((1, HIDDEN_LAYER_SIZE), jnp.float32)
    w2 = 0.1 * jax.random.normal(k2, (HIDDEN_LAYER_SIZE, OUT_FEATURES), jnp.float32)
    b2 = jnp.zeros((1, OUT_FEATURES), jnp.float32)
    return w1, b1, w2, b2


if __name__ == "__main__":
    key = jax.random.PRNGKey(0)
    pkey, ykey, ykey2 = jax.random.split(key, 3)
    w1, b1, w2, b2 = init_params(pkey)
    t = jnp.float32(0.0)  # unused by forward

    # --- small batch: single-block path ---
    B = 8
    y = jax.random.normal(ykey, (B, IN_FEATURES), jnp.float32)
    out = jax.block_until_ready(odefunc_forward(t, y, w1, b1, w2, b2))
    ref = jnp.tanh((y ** 3) @ w1 + b1) @ w2 + b2
    assert out.shape == (B, OUT_FEATURES)
    assert jnp.allclose(out, ref, atol=1e-5, rtol=1e-5)

    # --- larger non-multiple batch: tiled "parallel" (padded) path ---
    B2 = 300
    y2 = jax.random.normal(ykey2, (B2, IN_FEATURES), jnp.float32)
    out2 = jax.block_until_ready(odefunc_forward(t, y2, w1, b1, w2, b2))
    ref2 = jnp.tanh((y2 ** 3) @ w1 + b1) @ w2 + b2
    assert out2.shape == (B2, OUT_FEATURES)
    assert jnp.allclose(out2, ref2, atol=1e-5, rtol=1e-5)

    # --- fused forward-Euler: whole time loop inside one kernel ---
    n_steps, dt = 64, 0.01
    out_e = jax.block_until_ready(
        odefunc_euler_fused(0.0, dt, n_steps, y, w1, b1, w2, b2))
    y_ref = y
    for _ in range(n_steps):
        y_ref = y_ref + dt * (jnp.tanh((y_ref ** 3) @ w1 + b1) @ w2 + b2)
    assert jnp.allclose(out_e, y_ref, atol=1e-4, rtol=1e-4)

    print("KERNEL_OK")
</pallas_src>

<mosaic_0001>
module attributes {stable_mosaic.version = 11 : i64} {
  func.func @_odefunc_kernel(%arg0: i32, %arg1: memref<1xf32, #tpu.memory_space<smem>>, %arg2: memref<8x2xf32, #tpu.memory_space<vmem>>, %arg3: memref<2x50xf32, #tpu.memory_space<vmem>>, %arg4: memref<1x50xf32, #tpu.memory_space<vmem>>, %arg5: memref<50x2xf32, #tpu.memory_space<vmem>>, %arg6: memref<1x2xf32, #tpu.memory_space<vmem>>, %arg7: memref<8x2xf32, #tpu.memory_space<vmem>>) attributes {dimension_semantics = [#tpu.dimension_semantics<parallel>], iteration_bounds = array<i64: 1>, scalar_prefetch = 1 : i64, scratch_operands = 0 : i64, tpu.core_type = #tpu.core_type<tc>, window_params = [{transform_indices = @transform_0, window_bounds = array<i64: 8, 2>}, {pipeline_mode = #tpu.pipeline_mode<synchronous>, transform_indices = @transform_1, window_bounds = array<i64: 2, 50>}, {pipeline_mode = #tpu.pipeline_mode<synchronous>, transform_indices = @transform_2, window_bounds = array<i64: 1, 50>}, {pipeline_mode = #tpu.pipeline_mode<synchronous>, transform_indices = @transform_3, window_bounds = array<i64: 50, 2>}, {pipeline_mode = #tpu.pipeline_mode<synchronous>, transform_indices = @transform_4, window_bounds = array<i64: 1, 2>}, {transform_indices = @transform_5, window_bounds = array<i64: 8, 2>}]} {
    %c0 = arith.constant 0 : index
    %c0_0 = arith.constant 0 : index
    %0 = vector.load %arg2[%c0, %c0_0] : memref<8x2xf32, #tpu.memory_space<vmem>>, vector<8x2xf32>
    %c0_1 = arith.constant 0 : index
    %c0_2 = arith.constant 0 : index
    %1 = vector.load %arg3[%c0_1, %c0_2] : memref<2x50xf32, #tpu.memory_space<vmem>>, vector<2x50xf32>
    %c0_3 = arith.constant 0 : index
    %c0_4 = arith.constant 0 : index
    %2 = vector.load %arg4[%c0_3, %c0_4] : memref<1x50xf32, #tpu.memory_space<vmem>>, vector<1x50xf32>
    %c0_5 = arith.constant 0 : index
    %c0_6 = arith.constant 0 : index
    %3 = vector.load %arg5[%c0_5, %c0_6] : memref<50x2xf32, #tpu.memory_space<vmem>>, vector<50x2xf32>
    %c0_7 = arith.constant 0 : index
    %c0_8 = arith.constant 0 : index
    %4 = vector.load %arg6[%c0_7, %c0_8] : memref<1x2xf32, #tpu.memory_space<vmem>>, vector<1x2xf32>
    %5 = arith.mulf %0, %0 : vector<8x2xf32>
    %6 = arith.mulf %5, %0 : vector<8x2xf32>
    %7 = vector.extract_strided_slice %6 {offsets = [0, 0], sizes = [8, 1], strides = [1, 1]} : vector<8x2xf32> to vector<8x1xf32>
    %8 = vector.extract_strided_slice %1 {offsets = [0, 0], sizes = [1, 50], strides = [1, 1]} : vector<2x50xf32> to vector<1x50xf32>
    %9 = vector.broadcast %7 : vector<8x1xf32> to vector<8x50xf32>
    %10 = vector.broadcast %8 : vector<1x50xf32> to vector<8x50xf32>
    %11 = arith.mulf %9, %10 : vector<8x50xf32>
    %12 = vector.extract_strided_slice %6 {offsets = [0, 1], sizes = [8, 1], strides = [1, 1]} : vector<8x2xf32> to vector<8x1xf32>
    %13 = vector.extract_strided_slice %1 {offsets = [1, 0], sizes = [1, 50], strides = [1, 1]} : vector<2x50xf32> to vector<1x50xf32>
    %14 = vector.broadcast %12 : vector<8x1xf32> to vector<8x50xf32>
    %15 = vector.broadcast %13 : vector<1x50xf32> to vector<8x50xf32>
    %16 = arith.mulf %14, %15 : vector<8x50xf32>
    %17 = arith.addf %11, %16 : vector<8x50xf32>
    %18 = vector.broadcast %2 : vector<1x50xf32> to vector<8x50xf32>
    %19 = arith.addf %17, %18 : vector<8x50xf32>
    %20 = math.tanh %19 : vector<8x50xf32>
    %cst = arith.constant dense<0.000000e+00> : vector<8x2xf32>
    %21 = tpu.matmul %20, %3, %cst {dimension_numbers = #tpu.dot_dimension_numbers<[1], [0], [0], [1], [0, 0, 1, 1], [], []>} : vector<8x50xf32>, vector<50x2xf32>, vector<8x2xf32> -> vector<8x2xf32>
    %22 = vector.broadcast %4 : vector<1x2xf32> to vector<8x2xf32>
    %23 = arith.addf %21, %22 : vector<8x2xf32>
    %c0_9 = arith.constant 0 : index
    %c0_10 = arith.constant 0 : index
    %24 = vector.load %arg7[%c0_9, %c0_10] : memref<8x2xf32, #tpu.memory_space<vmem>>, vector<8x2xf32>
    tpu.vector_store %arg7[%c0_9, %c0_10], %23 {strides = array<i32>} : memref<8x2xf32, #tpu.memory_space<vmem>>, vector<8x2xf32>,
    return
  }
  func.func @transform_0(%arg0: i32, %arg1: memref<1xf32, #tpu.memory_space<smem>>) -> (i32, i32) {
    %c0_i32 = arith.constant 0 : i32
    %c0_i32_0 = arith.constant 0 : i32
    return %arg0, %c0_i32 : i32, i32
  }
  func.func @transform_1(%arg0: i32, %arg1: memref<1xf32, #tpu.memory_space<smem>>) -> (i32, i32) {
    %c0_i32 = arith.constant 0 : i32
    %c0_i32_0 = arith.constant 0 : i32
    %c0_i32_1 = arith.constant 0 : i32
    return %c0_i32, %c0_i32_0 : i32, i32
  }
  func.func @transform_2(%arg0: i32, %arg1: memref<1xf32, #tpu.memory_space<smem>>) -> (i32, i32) {
    %c0_i32 = arith.constant 0 : i32
    %c0_i32_0 = arith.constant 0 : i32
    %c0_i32_1 = arith.constant 0 : i32
    return %c0_i32, %c0_i32_0 : i32, i32
  }
  func.func @transform_3(%arg0: i32, %arg1: memref<1xf32, #tpu.memory_space<smem>>) -> (i32, i32) {
    %c0_i32 = arith.constant 0 : i32
    %c0_i32_0 = arith.constant 0 : i32
    %c0_i32_1 = arith.constant 0 : i32
    return %c0_i32, %c0_i32_0 : i32, i32
  }
  func.func @transform_4(%arg0: i32, %arg1: memref<1xf32, #tpu.memory_space<smem>>) -> (i32, i32) {
    %c0_i32 = arith.constant 0 : i32
    %c0_i32_0 = arith.constant 0 : i32
    %c0_i32_1 = arith.constant 0 : i32
    return %c0_i32, %c0_i32_0 : i32, i32
  }
  func.func @transform_5(%arg0: i32, %arg1: memref<1xf32, #tpu.memory_space<smem>>) -> (i32, i32) {
    %c0_i32 = arith.constant 0 : i32
    %c0_i32_0 = arith.constant 0 : i32
    return %arg0, %c0_i32 : i32, i32
  }
}

</mosaic_0001>

<bundles_post_ra>
// kernel: tpu_custom_call.1
= control target key start
LH: loop header
LB: loop body
LE: loop exit
PB: predicated region body
PF: predicated region fallthrough
CT: control target
= control target key end

     0   :  { %v190_v0 = vmov 0   ;;  %v191_v4 = vmov 1   ;;  %v192_v5 = vmov 0.0   ;;  %vm73_vm0 = vcmask 1041408   ;;  %s265_s1 = inlined_call_operand.vmem [shape: f32[8,2], index: 1, kind: input, shape index: {}]   ;;  %s266_s0 = inlined_call_operand.<no memory space> [shape: f32[1], index: 0, kind: input, shape index: {}]   ;;  %s267_s4 = inlined_call_operand.vmem [shape: f32[50,2], index: 4, kind: input, shape index: {}]   ;;  %s268_s2 = inlined_call_operand.vmem [shape: f32[2,50], index: 2, kind: input, shape index: {}]   ;;  %s269_s3 = inlined_call_operand.vmem [shape: f32[1,50], index: 3, kind: input, shape index: {}]   ;;  %s270_s5 = inlined_call_operand.vmem [shape: f32[1,2], index: 5, kind: input, shape index: {}]   ;;  %s271_s6 = inlined_call_operand.vmem [shape: f32[8,2], index: 6, kind: output, shape index: {}]  }
   0x1   :  { %186 = vset.pattern.permute.xlu0 %v190_v0  ;;  %v22_v1 = vld [vmem:[%s265_s1] sm:$0xff]  ;;  %165 = vmatprep.subr.mxu0 %v192_v5  ;;  %v31_v6 = vld [vmem:[%s267_s4 + $0x30] sm:$0x3]  ;;  %v30_v7 = vld [vmem:[%s267_s4 + $0x28] sm:$0xff]  ;;  %vm193_vm1 = vmmov 0   ;;  %v40_v13 = vlaneseq  ;;  %vm69_vm2 = vcmask 408576  }
   0x2   :  { %v33_v2 = vmul.f32 %v22_v1, %v22_v1  ;;  %166 = vmatpush3.msk.msra.mxu0 %vm73_vm0, %v31_v6  ;;  %179 = vmatprep.mubr.msk.f32.mxu0 %vm193_vm1, %v192_v5  ;;  %v29_v8 = vld [vmem:[%s267_s4 + $0x20] sm:$0xff]  ;;  %v28_v9 = vld [vmem:[%s267_s4 + $0x18] sm:$0xff]  ;;  %v27_v10 = vld [vmem:[%s267_s4 + $0x10] sm:$0xff]  ;;  %vm147_vm3 = vcmask 15360  }
   0x3   :  { %167 = vmatprep.subr.mxu0 %v192_v5  ;;  %v26_v11 = vld [vmem:[%s267_s4 + $0x8] sm:$0xff]  ;;  %v25_v12 = vld [vmem:[%s267_s4] sm:$0xff]  ;;  %v41_v14 = vshrl.u32 %v40_v13, 7 }
   0x4   :  { %v34_v3 = vmul.f32 %v33_v2, %v22_v1  ;;  %168 = vmatpush3.msra.mxu0 %v30_v7  ;;  %v23_v17 = vld [vmem:[%s268_s2] sm:$0x3] }
   0x5   :  { %169 = vmatprep.subr.mxu0 %v192_v5  ;;  %v42_v15 = vsub.s32 0, %v41_v14  ;;  %v51_v16 = vsub.s32 1, %v41_v14  ;;  %v153_v24 = vld [vmem:[%s269_s3] ss:$0 sm:$0xff] }
   0x6   :  { %37 = vperm.xlu0 %186, %v34_v3   ;;  %170 = vmatpush3.msra.mxu0 %v29_v8  ;;  %v154_v28 = vld [vmem:[%s270_s5] ss:$0 sm:$0xff] }
   0x7   :  { %171 = vmatprep.subr.mxu0 %v192_v5  ;;  %v43_v19 = vrot.slane %v23_v17, %v42_v15  ;;  %v52_v20 = vrot.slane %v23_v17, %v51_v16 }
   0x8   :  { %172 = vmatpush3.msra.mxu0 %v28_v9 }
   0x9   :  { %173 = vmatprep.subr.mxu0 %v192_v5 }
   0xa   :  { %187 = vset.pattern.permute.xlu0 %v191_v4  ;;  %174 = vmatpush3.msra.mxu0 %v27_v10 }
   0xb   :  { %46 = vperm.xlu0 %187, %v34_v3   ;;  %175 = vmatprep.subr.mxu0 %v192_v5 }
   0xc   :  { %176 = vmatpush3.msra.mxu0 %v26_v11 }
   0xd   :  { %177 = vmatprep.subr.mxu0 %v192_v5 }
   0xe   :  { %178 = vmatpush3.msra.mxu0 %v25_v12 }
  0x81   :  { %v38_v18 = vpop.permute.xlu0 %37 }
  0x82   :  { %v44_v22 = vmul.f32 %v43_v19, %v38_v18 }
  0x86   :  { %v47_v21 = vpop.permute.xlu0 %46 }
  0x87   :  { %v53_v23 = vmul.f32 %v52_v20, %v47_v21 }
  0x89   :  { %v54_v25 = vadd.f32 %v53_v23, %v44_v22 }
  0x8b   :  { %v61_v26 = vadd.f32 %v153_v24, %v54_v25 }
  0x8d   :  { %188 = vtanh.f32 %v61_v26 }
  0x9a   :  { %v189_v27 = vpop.eup %188 }
  0x9b   :  { %180 = vmatmul.mubr.msk.f32.vlgmr.msra.gmra.mxu0 %vm69_vm2, %v189_v27 }
 0x15b   :  { %v143_v29 = vpop.f32.mrf.mxu0 }
 0x15c   :  { %v144_v30 = vadd.f32 %v154_v28, %v143_v29 }
 0x15d   :  { %v181_v31 = vpop.f32.mrf.mxu0 }
 0x15e   :  { %148 = vst.msk [vmem:[%s271_s6] sm:$0xff] %vm147_vm3, %v144_v30 }

</bundles_post_ra>
